<compile_context>
chip_gen: v7x
topology: tpu7x:2x2x1
jax: 0.10.0
libtpu: 0.0.40
codegen_flags: <defaults>
</compile_context>

<pallas_src>
import math
from functools import partial

import jax
import jax.numpy as jnp
import numpy as np
from jax.experimental import pallas as pl
from jax.experimental.pallas import tpu as pltpu


def _swap01(x):
    """(a, b, d) -> (b, a, d); lane (last) dim untouched."""
    if hasattr(pltpu, "einshape"):
        return pltpu.einshape("abd->bad", x)      # lane-layout-aware permute
    return jnp.swapaxes(x, 0, 1)


def _cross_attention_kernel(q_ref, c_ref, wqT_ref, wkvT_ref, bq_ref, bkv_ref,
                            woT_ref, bo_ref, ln_g_ref, ln_b_ref, o_ref,
                            *, num_heads, eps):
    """One grid step processes `block_b` batch elements entirely in VMEM."""
    block_b, S, E = q_ref.shape
    T = c_ref.shape[1]
    H = num_heads
    Dh = E // H
    Z = block_b * H                      # fused (head, batch) contraction depth
    mm_dtype = wqT_ref.dtype             # bf16 on the MXU, f32 accumulation

    # Flatten the batch block into the GEMM row dimension (bigger M for the MXU).
    qf = q_ref[...].reshape(block_b * S, E)
    cf = c_ref[...].reshape(block_b * T, E)

    # Projections. Weights are pre-transposed + bf16 in the wrapper, the
    # 1/sqrt(Dh) scale is folded into wqT/bq, and K|V share one fused (E, 2E)
    # GEMM. MXU operands in bf16, accumulation in f32.
    Q = jnp.dot(qf.astype(mm_dtype), wqT_ref[...],
                preferred_element_type=jnp.float32) + bq_ref[...]
    KV = jnp.dot(cf.astype(mm_dtype), wkvT_ref[...],
                 preferred_element_type=jnp.float32) + bkv_ref[...]
    K = KV[:, :E]
    V = KV[:, E:]

    # Head split, done once for the whole block:
    #   (bb*S, E) -> (bb*S, H, Dh) -> (H, bb*S, Dh) -> (H*bb, S, Dh)
    # The final reshape is linear-order preserving (z = h*bb + b), so Q/K/V
    # all share the same z ordering and the attention stays per-(b, h).
    Qz = _swap01(Q.reshape(block_b * S, H, Dh)).reshape(Z, S, Dh)
    Kz = _swap01(K.reshape(block_b * T, H, Dh)).reshape(Z, T, Dh)
    Vz = _swap01(V.reshape(block_b * T, H, Dh)).reshape(Z, T, Dh)

    # Attention: single batched 3-D contraction over all heads and all batch
    # elements in the block (no per-batch loop, no per-head GEMMs).
    s = jnp.einsum("zqd,zkd->zqk", Qz.astype(mm_dtype), Kz.astype(mm_dtype),
                   preferred_element_type=jnp.float32)          # (Z, S, T) f32
    s = s - jnp.max(s, axis=-1, keepdims=True)
    p = jnp.exp(s)                                              # f32 on the EUP
    denom = jnp.sum(p, axis=-1, keepdims=True)                  # (Z, S, 1)
    inv = pl.reciprocal(denom, approx=True)                     # EUP slot
    inv = inv * (2.0 - denom * inv)                             # Newton step -> f32 accuracy

    o = jnp.einsum("zqk,zkd->zqd", p.astype(mm_dtype), Vz.astype(mm_dtype),
                   preferred_element_type=jnp.float32)          # (Z, S, Dh)
    o = o * inv                                                 # deferred softmax norm (Dh << T)

    # Head merge back to (bb*S, E) (inverse of the split above).
    attn = _swap01(o.reshape(H, block_b * S, Dh)).reshape(block_b * S, E)

    # Output projection + residual + LayerNorm (f32 math throughout).
    out = jnp.dot(attn.astype(mm_dtype), woT_ref[...],
                  preferred_element_type=jnp.float32) + bo_ref[...]
    out = out + qf.astype(jnp.float32)

    mu = jnp.mean(out, axis=-1, keepdims=True)
    var = jnp.mean((out - mu) ** 2, axis=-1, keepdims=True)     # biased, like PyTorch
    xhat = (out - mu) * jax.lax.rsqrt(var + eps)
    y = xhat * ln_g_ref[...] + ln_b_ref[...]

    o_ref[...] = y.reshape(block_b, S, E).astype(o_ref.dtype)


def cross_attention(q, c, params, num_heads, eps=1e-5, block_b=None):
    """q: (B, S, E), c: (B, T, E). Returns (B, S, E)."""
    B, S, E = q.shape
    _, T, _ = c.shape
    assert E % num_heads == 0
    Dh = E // num_heads
    scale = 1.0 / math.sqrt(Dh)
    mm_dtype = jnp.bfloat16                    # MXU-native on v5e / v6e / v7x

    # One-time wrapper-side weight prep (plain XLA ops, outside the kernel).
    wqT = (params["wq"].T * scale).astype(mm_dtype)                   # (E, E), scale folded
    bq = params["bqkv"][:, :E] * scale                                # (1, E) f32
    wkvT = jnp.concatenate([params["wk"].T, params["wv"].T],
                           axis=1).astype(mm_dtype)                   # (E, 2E), fused K|V
    bkv = params["bqkv"][:, E:]                                       # (1, 2E) f32
    woT = params["wo"].T.astype(mm_dtype)                             # (E, E)
    bo, ln_g, ln_b = params["bo"], params["ln_b" if False else "bo"], None  # placeholder (set below)
    bo = params["bo"]                                                 # (1, E)
    ln_g = params["ln_g"]                                             # (1, E)
    ln_b = params["ln_b"]                                             # (1, E)

    in_itemsize = q.dtype.itemsize
    out_itemsize = q.dtype.itemsize
    weight_bytes = 2 * (wqT.size + wkvT.size + woT.size)              # bf16
    bias_bytes = 4 * (bq.size + bkv.size + bo.size + ln_g.size + ln_b.size)

    def footprint(bb):
        """Approximate per-step VMEM bytes for a given batch block."""
        # Pallas double-buffers the pipelined q / c / out blocks.
        io = 2 * bb * (S * E * in_itemsize + T * E * in_itemsize + S * E * out_itemsize)
        # Grid-invariant weights/biases (default double-buffered).
        wb = 2 * (weight_bytes + bias_bytes)
        # f32 intermediates: Q, K, V, scores+probs, PV output, post-LN temps.
        interm = 4 * bb * ((S + 2 * T) * E
                           + 2 * num_heads * S * T
                           + 3 * S * E)
        # bf16 copies of MXU operands.
        interm += 2 * bb * ((S + 3 * T) * E + num_heads * S * T + S * E)
        return io + wb + interm

    # Generation-aware VMEM budget (v5e/v6e: 128 MiB, v7x: 64 MiB per TC).
    try:
        info = pltpu.get_tpu_info()
        vmem_cap = int(getattr(info, "vmem_capacity_bytes", 64 << 20))
        if vmem_cap <= 0:
            vmem_cap = 64 << 20
    except Exception:
        vmem_cap = 64 << 20
    vmem_budget = int(min((vmem_cap * 3) // 4, 96 << 20))

    # Fuse several batch elements per grid step (amortize ~0.35us/step, larger
    # GEMM M -- ideally block_b*S >= 256 for the v6e/v7x MXU), but:
    #   * stay inside the VMEM budget including weights and double-buffering,
    #   * keep grid >= 2 so both v7x TensorCores get work ("parallel" axis).
    if block_b is None:
        max_bb = max(1, B // 2) if B >= 2 else 1
        block_b = 1
        for d in range(1, max_bb + 1):
            if B % d == 0 and footprint(d) <= vmem_budget:
                block_b = d
    assert B % block_b == 0

    vmem_limit = int(min(vmem_cap, max(vmem_budget, (footprint(block_b) * 5) // 4)))

    # Advisory cost estimate for XLA scheduling.
    flops = 2 * B * (S * E * E + T * E * 2 * E + 2 * S * T * E + S * E * E)
    transcendentals = B * num_heads * S * T
    bytes_accessed = (in_itemsize * (2 * B * S * E + B * T * E)
                      + weight_bytes + bias_bytes)

    kernel = partial(_cross_attention_kernel, num_heads=num_heads, eps=eps)

    def full_block(arr):
        return pl.BlockSpec(arr.shape, lambda i: (0, 0))

    return pl.pallas_call(
        kernel,
        out_shape=jax.ShapeDtypeStruct((B, S, E), q.dtype),
        grid=(B // block_b,),
        in_specs=[
            pl.BlockSpec((block_b, S, E), lambda i: (i, 0, 0)),   # q
            pl.BlockSpec((block_b, T, E), lambda i: (i, 0, 0)),   # c
            full_block(wqT),                                      # Wq^T (scaled, bf16)
            full_block(wkvT),                                     # [Wk^T | Wv^T] (bf16)
            full_block(bq),                                       # bq (scaled)
            full_block(bkv),                                      # [bk | bv]
            full_block(woT),                                      # Wo^T (bf16)
            full_block(bo),                                       # bo
            full_block(ln_g),                                     # LayerNorm gamma
            full_block(ln_b),                                     # LayerNorm beta
        ],
        out_specs=pl.BlockSpec((block_b, S, E), lambda i: (i, 0, 0)),
        compiler_params=pltpu.CompilerParams(
            dimension_semantics=("parallel",),
            vmem_limit_bytes=vmem_limit),
        cost_estimate=pl.CostEstimate(flops=flops,
                                      transcendentals=transcendentals,
                                      bytes_accessed=bytes_accessed),
    )(q, c, wqT, wkvT, bq, bkv, woT, bo, ln_g, ln_b)


def cross_attention_reference(q, c, params, num_heads, eps=1e-5):
    """Pure-JAX f32 reference mirroring torch.nn.MultiheadAttention + residual + LayerNorm."""
    B, S, E = q.shape
    T = c.shape[1]
    Dh = E // num_heads
    bq = params["bqkv"][0, :E]
    bk = params["bqkv"][0, E:2 * E]
    bv = params["bqkv"][0, 2 * E:]
    Q = q @ params["wq"].T + bq
    K = c @ params["wk"].T + bk
    V = c @ params["wv"].T + bv
    Q = Q.reshape(B, S, num_heads, Dh).transpose(0, 2, 1, 3)
    K = K.reshape(B, T, num_heads, Dh).transpose(0, 2, 1, 3)
    V = V.reshape(B, T, num_heads, Dh).transpose(0, 2, 1, 3)
    s = jnp.einsum("bhsd,bhtd->bhst", Q, K) / jnp.sqrt(Dh).astype(q.dtype)
    p = jax.nn.softmax(s, axis=-1)
    o = jnp.einsum("bhst,bhtd->bhsd", p, V).transpose(0, 2, 1, 3).reshape(B, S, E)
    o = o @ params["wo"].T + params["bo"][0]
    o = o + q
    mu = jnp.mean(o, axis=-1, keepdims=True)
    var = jnp.mean((o - mu) ** 2, axis=-1, keepdims=True)
    return ((o - mu) / jnp.sqrt(var + eps)) * params["ln_g"][0] + params["ln_b"][0]


def make_params(key, embed_dim):
    """Deterministic synthetic parameters matching nn.MultiheadAttention + nn.LayerNorm shapes."""
    E = embed_dim
    ks = jax.random.split(key, 6)
    scale = 0.05
    wq = jax.random.normal(ks[0], (E, E), jnp.float32) * scale
    wk = jax.random.normal(ks[1], (E, E), jnp.float32) * scale
    wv = jax.random.normal(ks[2], (E, E), jnp.float32) * scale
    bqkv = jax.random.normal(ks[3], (1, 3 * E), jnp.float32) * scale
    wo = jax.random.normal(ks[4], (E, E), jnp.float32) * scale
    bo = jax.random.normal(ks[5], (1, E), jnp.float32) * scale
    ln_g = jnp.ones((1, E), jnp.float32)
    ln_b = jnp.zeros((1, E), jnp.float32)
    return dict(wq=wq, wk=wk, wv=wv, bqkv=bqkv, wo=wo, bo=bo, ln_g=ln_g, ln_b=ln_b)


if __name__ == "__main__":
    B, S, T, E, H = 2, 8, 8, 32, 4   # batch, query seq, context seq, embed_dim, num_heads

    key = jax.random.PRNGKey(0)
    kq, kc, kp = jax.random.split(key, 3)
    q = jax.random.normal(kq, (B, S, E), jnp.float32)
    c = jax.random.normal(kc, (B, T, E), jnp.float32)
    params = make_params(kp, E)

    out = cross_attention(q, c, params, num_heads=H)
    out = jax.block_until_ready(out)

    ref = cross_attention_reference(q, c, params, num_heads=H)
    # Kernel intentionally runs its matmuls in bf16 (MXU-native), so compare
    # against the f32 reference with a bf16-appropriate tolerance.
    np.testing.assert_allclose(np.asarray(out), np.asarray(ref), atol=2e-2, rtol=2e-2)

    print("KERNEL_OK")
</pallas_src>

<mosaic_0001>
module attributes {stable_mosaic.version = 11 : i64} {
  func.func @_cross_attention_kernel(%arg0: i32, %arg1: memref<1x8x32xf32, #tpu.memory_space<vmem>>, %arg2: memref<1x8x32xf32, #tpu.memory_space<vmem>>, %arg3: memref<32x32xbf16, #tpu.memory_space<vmem>>, %arg4: memref<32x64xbf16, #tpu.memory_space<vmem>>, %arg5: memref<1x32xf32, #tpu.memory_space<vmem>>, %arg6: memref<1x64xf32, #tpu.memory_space<vmem>>, %arg7: memref<32x32xbf16, #tpu.memory_space<vmem>>, %arg8: memref<1x32xf32, #tpu.memory_space<vmem>>, %arg9: memref<1x32xf32, #tpu.memory_space<vmem>>, %arg10: memref<1x32xf32, #tpu.memory_space<vmem>>, %arg11: memref<1x8x32xf32, #tpu.memory_space<vmem>>) attributes {dimension_semantics = [#tpu.dimension_semantics<parallel>], iteration_bounds = array<i64: 2>, scalar_prefetch = 0 : i64, scratch_operands = 0 : i64, tpu.core_type = #tpu.core_type<tc>, window_params = [{transform_indices = @transform_0, window_bounds = array<i64: 1, 8, 32>}, {transform_indices = @transform_1, window_bounds = array<i64: 1, 8, 32>}, {pipeline_mode = #tpu.pipeline_mode<synchronous>, transform_indices = @transform_2, window_bounds = array<i64: 32, 32>}, {pipeline_mode = #tpu.pipeline_mode<synchronous>, transform_indices = @transform_3, window_bounds = array<i64: 32, 64>}, {pipeline_mode = #tpu.pipeline_mode<synchronous>, transform_indices = @transform_4, window_bounds = array<i64: 1, 32>}, {pipeline_mode = #tpu.pipeline_mode<synchronous>, transform_indices = @transform_5, window_bounds = array<i64: 1, 64>}, {pipeline_mode = #tpu.pipeline_mode<synchronous>, transform_indices = @transform_6, window_bounds = array<i64: 32, 32>}, {pipeline_mode = #tpu.pipeline_mode<synchronous>, transform_indices = @transform_7, window_bounds = array<i64: 1, 32>}, {pipeline_mode = #tpu.pipeline_mode<synchronous>, transform_indices = @transform_8, window_bounds = array<i64: 1, 32>}, {pipeline_mode = #tpu.pipeline_mode<synchronous>, transform_indices = @transform_9, window_bounds = array<i64: 1, 32>}, {transform_indices = @transform_10, window_bounds = array<i64: 1, 8, 32>}]} {
    %c0 = arith.constant 0 : index
    %c0_0 = arith.constant 0 : index
    %c0_1 = arith.constant 0 : index
    %0 = vector.load %arg1[%c0, %c0_0, %c0_1] : memref<1x8x32xf32, #tpu.memory_space<vmem>>, vector<1x8x32xf32>
    %1 = vector.shape_cast %0 : vector<1x8x32xf32> to vector<8x32xf32>
    %c0_2 = arith.constant 0 : index
    %c0_3 = arith.constant 0 : index
    %c0_4 = arith.constant 0 : index
    %2 = vector.load %arg2[%c0_2, %c0_3, %c0_4] : memref<1x8x32xf32, #tpu.memory_space<vmem>>, vector<1x8x32xf32>
    %3 = vector.shape_cast %2 : vector<1x8x32xf32> to vector<8x32xf32>
    %4 = arith.truncf %1 : vector<8x32xf32> to vector<8x32xbf16>
    %c0_5 = arith.constant 0 : index
    %c0_6 = arith.constant 0 : index
    %5 = vector.load %arg3[%c0_5, %c0_6] : memref<32x32xbf16, #tpu.memory_space<vmem>>, vector<32x32xbf16>
    %cst = arith.constant dense<0.000000e+00> : vector<8x32xf32>
    %6 = tpu.matmul %4, %5, %cst {dimension_numbers = #tpu.dot_dimension_numbers<[1], [0], [0], [1], [0, 0, 1, 1], [], []>} : vector<8x32xbf16>, vector<32x32xbf16>, vector<8x32xf32> -> vector<8x32xf32>
    %c0_7 = arith.constant 0 : index
    %c0_8 = arith.constant 0 : index
    %7 = vector.load %arg5[%c0_7, %c0_8] : memref<1x32xf32, #tpu.memory_space<vmem>>, vector<1x32xf32>
    %8 = vector.broadcast %7 : vector<1x32xf32> to vector<8x32xf32>
    %9 = arith.addf %6, %8 : vector<8x32xf32>
    %10 = arith.truncf %3 : vector<8x32xf32> to vector<8x32xbf16>
    %c0_9 = arith.constant 0 : index
    %c0_10 = arith.constant 0 : index
    %11 = vector.load %arg4[%c0_9, %c0_10] : memref<32x64xbf16, #tpu.memory_space<vmem>>, vector<32x64xbf16>
    %cst_11 = arith.constant dense<0.000000e+00> : vector<8x64xf32>
    %12 = tpu.matmul %10, %11, %cst_11 {dimension_numbers = #tpu.dot_dimension_numbers<[1], [0], [0], [1], [0, 0, 1, 1], [], []>} : vector<8x32xbf16>, vector<32x64xbf16>, vector<8x64xf32> -> vector<8x64xf32>
    %c0_12 = arith.constant 0 : index
    %c0_13 = arith.constant 0 : index
    %13 = vector.load %arg6[%c0_12, %c0_13] : memref<1x64xf32, #tpu.memory_space<vmem>>, vector<1x64xf32>
    %14 = vector.broadcast %13 : vector<1x64xf32> to vector<8x64xf32>
    %15 = arith.addf %12, %14 : vector<8x64xf32>
    %16 = vector.extract_strided_slice %15 {offsets = [0, 0], sizes = [8, 32], strides = [1, 1]} : vector<8x64xf32> to vector<8x32xf32>
    %17 = vector.extract_strided_slice %15 {offsets = [0, 32], sizes = [8, 32], strides = [1, 1]} : vector<8x64xf32> to vector<8x32xf32>
    %18 = vector.shape_cast %9 : vector<8x32xf32> to vector<8x4x8xf32>
    %19 = tpu.transpose %18, [1, 0, 2] : vector<8x4x8xf32> -> vector<4x8x8xf32>
    %20 = vector.shape_cast %16 : vector<8x32xf32> to vector<8x4x8xf32>
    %21 = tpu.transpose %20, [1, 0, 2] : vector<8x4x8xf32> -> vector<4x8x8xf32>
    %22 = vector.shape_cast %17 : vector<8x32xf32> to vector<8x4x8xf32>
    %23 = tpu.transpose %22, [1, 0, 2] : vector<8x4x8xf32> -> vector<4x8x8xf32>
    %24 = arith.truncf %19 : vector<4x8x8xf32> to vector<4x8x8xbf16>
    %25 = arith.truncf %21 : vector<4x8x8xf32> to vector<4x8x8xbf16>
    "tpu.trace_start"() <{level = 10 : i32, message = "zqd,zkd->zqk"}> : () -> ()
    %cst_14 = arith.constant dense<0.000000e+00> : vector<4x8x8xf32>
    %26 = tpu.matmul %24, %25, %cst_14 {dimension_numbers = #tpu.dot_dimension_numbers<[2], [2], [1], [1], [0, 0, 0, 1, 1, 1], [0], [0]>} : vector<4x8x8xbf16>, vector<4x8x8xbf16>, vector<4x8x8xf32> -> vector<4x8x8xf32>
    "tpu.trace_stop"() : () -> ()
    %cst_15 = arith.constant dense<0xFF800000> : vector<4x8xf32>
    %27 = vector.multi_reduction <maximumf>, %26, %cst_15 [2] : vector<4x8x8xf32> to vector<4x8xf32>
    %28 = vector.shape_cast %27 : vector<4x8xf32> to vector<4x8x1xf32>
    %29 = vector.broadcast %28 : vector<4x8x1xf32> to vector<4x8x8xf32>
    %30 = arith.subf %26, %29 : vector<4x8x8xf32>
    %31 = math.exp %30 : vector<4x8x8xf32>
    %cst_16 = arith.constant dense<0.000000e+00> : vector<4x8xf32>
    %32 = vector.multi_reduction <add>, %31, %cst_16 [2] : vector<4x8x8xf32> to vector<4x8xf32>
    %33 = vector.shape_cast %32 : vector<4x8xf32> to vector<4x8x1xf32>
    %34 = tpu.reciprocal %33 {approx = true} : vector<4x8x1xf32> -> vector<4x8x1xf32>
    %35 = arith.mulf %33, %34 : vector<4x8x1xf32>
    %cst_17 = arith.constant 2.000000e+00 : f32
    %36 = vector.broadcast %cst_17 : f32 to vector<4x8x1xf32>
    %37 = arith.subf %36, %35 : vector<4x8x1xf32>
    %38 = arith.mulf %34, %37 : vector<4x8x1xf32>
    %39 = arith.truncf %31 : vector<4x8x8xf32> to vector<4x8x8xbf16>
    %40 = arith.truncf %23 : vector<4x8x8xf32> to vector<4x8x8xbf16>
    "tpu.trace_start"() <{level = 10 : i32, message = "zqk,zkd->zqd"}> : () -> ()
    %cst_18 = arith.constant dense<0.000000e+00> : vector<4x8x8xf32>
    %41 = tpu.matmul %39, %40, %cst_18 {dimension_numbers = #tpu.dot_dimension_numbers<[2], [1], [1], [2], [0, 0, 0, 1, 1, 2], [0], [0]>} : vector<4x8x8xbf16>, vector<4x8x8xbf16>, vector<4x8x8xf32> -> vector<4x8x8xf32>
    "tpu.trace_stop"() : () -> ()
    %42 = vector.broadcast %38 : vector<4x8x1xf32> to vector<4x8x8xf32>
    %43 = arith.mulf %41, %42 : vector<4x8x8xf32>
    %44 = tpu.transpose %43, [1, 0, 2] : vector<4x8x8xf32> -> vector<8x4x8xf32>
    %45 = vector.shape_cast %44 : vector<8x4x8xf32> to vector<8x32xf32>
    %46 = arith.truncf %45 : vector<8x32xf32> to vector<8x32xbf16>
    %c0_19 = arith.constant 0 : index
    %c0_20 = arith.constant 0 : index
    %47 = vector.load %arg7[%c0_19, %c0_20] : memref<32x32xbf16, #tpu.memory_space<vmem>>, vector<32x32xbf16>
    %cst_21 = arith.constant dense<0.000000e+00> : vector<8x32xf32>
    %48 = tpu.matmul %46, %47, %cst_21 {dimension_numbers = #tpu.dot_dimension_numbers<[1], [0], [0], [1], [0, 0, 1, 1], [], []>} : vector<8x32xbf16>, vector<32x32xbf16>, vector<8x32xf32> -> vector<8x32xf32>
    %c0_22 = arith.constant 0 : index
    %c0_23 = arith.constant 0 : index
    %49 = vector.load %arg8[%c0_22, %c0_23] : memref<1x32xf32, #tpu.memory_space<vmem>>, vector<1x32xf32>
    %50 = vector.broadcast %49 : vector<1x32xf32> to vector<8x32xf32>
    %51 = arith.addf %48, %50 : vector<8x32xf32>
    %52 = arith.addf %51, %1 : vector<8x32xf32>
    %cst_24 = arith.constant dense<0.000000e+00> : vector<8xf32>
    %53 = vector.multi_reduction <add>, %52, %cst_24 [1] : vector<8x32xf32> to vector<8xf32>
    %54 = vector.shape_cast %53 : vector<8xf32> to vector<8x1xf32>
    %cst_25 = arith.constant 3.200000e+01 : f32
    %55 = vector.broadcast %cst_25 : f32 to vector<8x1xf32>
    %56 = arith.divf %54, %55 : vector<8x1xf32>
    %57 = vector.broadcast %56 : vector<8x1xf32> to vector<8x32xf32>
    %58 = arith.subf %52, %57 : vector<8x32xf32>
    %59 = arith.mulf %58, %58 : vector<8x32xf32>
    %cst_26 = arith.constant dense<0.000000e+00> : vector<8xf32>
    %60 = vector.multi_reduction <add>, %59, %cst_26 [1] : vector<8x32xf32> to vector<8xf32>
    %61 = vector.shape_cast %60 : vector<8xf32> to vector<8x1xf32>
    %cst_27 = arith.constant 3.200000e+01 : f32
    %62 = vector.broadcast %cst_27 : f32 to vector<8x1xf32>
    %63 = arith.divf %61, %62 : vector<8x1xf32>
    %64 = vector.broadcast %56 : vector<8x1xf32> to vector<8x32xf32>
    %65 = arith.subf %52, %64 : vector<8x32xf32>
    %cst_28 = arith.constant 9.99999974E-6 : f32
    %66 = vector.broadcast %cst_28 : f32 to vector<8x1xf32>
    %67 = arith.addf %63, %66 : vector<8x1xf32>
    %68 = math.rsqrt %67 : vector<8x1xf32>
    %69 = vector.broadcast %68 : vector<8x1xf32> to vector<8x32xf32>
    %70 = arith.mulf %65, %69 : vector<8x32xf32>
    %c0_29 = arith.constant 0 : index
    %c0_30 = arith.constant 0 : index
    %71 = vector.load %arg9[%c0_29, %c0_30] : memref<1x32xf32, #tpu.memory_space<vmem>>, vector<1x32xf32>
    %72 = vector.broadcast %71 : vector<1x32xf32> to vector<8x32xf32>
    %73 = arith.mulf %70, %72 : vector<8x32xf32>
    %c0_31 = arith.constant 0 : index
    %c0_32 = arith.constant 0 : index
    %74 = vector.load %arg10[%c0_31, %c0_32] : memref<1x32xf32, #tpu.memory_space<vmem>>, vector<1x32xf32>
    %75 = vector.broadcast %74 : vector<1x32xf32> to vector<8x32xf32>
    %76 = arith.addf %73, %75 : vector<8x32xf32>
    %77 = vector.shape_cast %76 : vector<8x32xf32> to vector<1x8x32xf32>
    %c0_33 = arith.constant 0 : index
    %c0_34 = arith.constant 0 : index
    %c0_35 = arith.constant 0 : index
    %78 = vector.load %arg11[%c0_33, %c0_34, %c0_35] : memref<1x8x32xf32, #tpu.memory_space<vmem>>, vector<1x8x32xf32>
    tpu.vector_store %arg11[%c0_33, %c0_34, %c0_35], %77 {strides = array<i32>} : memref<1x8x32xf32, #tpu.memory_space<vmem>>, vector<1x8x32xf32>,
    return
  }
  func.func @transform_0(%arg0: i32) -> (i32, i32, i32) {
    %c0_i32 = arith.constant 0 : i32
    %c0_i32_0 = arith.constant 0 : i32
    %c0_i32_1 = arith.constant 0 : i32
    return %arg0, %c0_i32, %c0_i32_0 : i32, i32, i32
  }
  func.func @transform_1(%arg0: i32) -> (i32, i32, i32) {
    %c0_i32 = arith.constant 0 : i32
    %c0_i32_0 = arith.constant 0 : i32
    %c0_i32_1 = arith.constant 0 : i32
    return %arg0, %c0_i32, %c0_i32_0 : i32, i32, i32
  }
  func.func @transform_2(%arg0: i32) -> (i32, i32) {
    %c0_i32 = arith.constant 0 : i32
    %c0_i32_0 = arith.constant 0 : i32
    %c0_i32_1 = arith.constant 0 : i32
    return %c0_i32, %c0_i32_0 : i32, i32
  }
  func.func @transform_3(%arg0: i32) -> (i32, i32) {
    %c0_i32 = arith.constant 0 : i32
    %c0_i32_0 = arith.constant 0 : i32
    %c0_i32_1 = arith.constant 0 : i32
    return %c0_i32, %c0_i32_0 : i32, i32
  }
  func.func @transform_4(%arg0: i32) -> (i32, i32) {
    %c0_i32 = arith.constant 0 : i32
    %c0_i32_0 = arith.constant 0 : i32
    %c0_i32_1 = arith.constant 0 : i32
    return %c0_i32, %c0_i32_0 : i32, i32
  }
  func.func @transform_5(%arg0: i32) -> (i32, i32) {
    %c0_i32 = arith.constant 0 : i32
    %c0_i32_0 = arith.constant 0 : i32
    %c0_i32_1 = arith.constant 0 : i32
    return %c0_i32, %c0_i32_0 : i32, i32
  }
  func.func @transform_6(%arg0: i32) -> (i32, i32) {
    %c0_i32 = arith.constant 0 : i32
    %c0_i32_0 = arith.constant 0 : i32
    %c0_i32_1 = arith.constant 0 : i32
    return %c0_i32, %c0_i32_0 : i32, i32
  }
  func.func @transform_7(%arg0: i32) -> (i32, i32) {
    %c0_i32 = arith.constant 0 : i32
    %c0_i32_0 = arith.constant 0 : i32
    %c0_i32_1 = arith.constant 0 : i32
    return %c0_i32, %c0_i32_0 : i32, i32
  }
  func.func @transform_8(%arg0: i32) -> (i32, i32) {
    %c0_i32 = arith.constant 0 : i32
    %c0_i32_0 = arith.constant 0 : i32
    %c0_i32_1 = arith.constant 0 : i32
    return %c0_i32, %c0_i32_0 : i32, i32
  }
  func.func @transform_9(%arg0: i32) -> (i32, i32) {
    %c0_i32 = arith.constant 0 : i32
    %c0_i32_0 = arith.constant 0 : i32
    %c0_i32_1 = arith.constant 0 : i32
    return %c0_i32, %c0_i32_0 : i32, i32
  }
  func.func @transform_10(%arg0: i32) -> (i32, i32, i32) {
    %c0_i32 = arith.constant 0 : i32
    %c0_i32_0 = arith.constant 0 : i32
    %c0_i32_1 = arith.constant 0 : i32
    return %arg0, %c0_i32, %c0_i32_0 : i32, i32, i32
  }
}

</mosaic_0001>

<bundles_post_ra>
// kernel: tpu_custom_call.1
= control target key start
LH: loop header
LB: loop body
LE: loop exit
PB: predicated region body
PF: predicated region fallthrough
CT: control target
= control target key end

     0   :  { %s2820_s0 = inlined_call_operand.hbm [shape: f32[2,8,32], index: 0, kind: input, shape index: {}]   ;;  %s2821_s1 = inlined_call_operand.hbm [shape: f32[2,8,32], index: 1, kind: input, shape index: {}]   ;;  %s2822_s2 = inlined_call_operand.hbm [shape: bf16[32,32], index: 2, kind: input, shape index: {}]   ;;  %s2823_s3 = inlined_call_operand.hbm [shape: bf16[32,64], index: 3, kind: input, shape index: {}]   ;;  %s2824_s4 = inlined_call_operand.vmem [shape: f32[1,32], index: 4, kind: input, shape index: {}]   ;;  %s2825_s5 = inlined_call_operand.vmem [shape: f32[1,64], index: 5, kind: input, shape index: {}]   ;;  %s2826_s6 = inlined_call_operand.vmem [shape: bf16[32,32], index: 6, kind: input, shape index: {}]   ;;  %s2827_s7 = inlined_call_operand.vmem [shape: f32[1,32], index: 7, kind: input, shape index: {}]   ;;  %s2828_s8 = inlined_call_operand.vmem [shape: f32[1,32], index: 8, kind: input, shape index: {}]   ;;  %s2829_s9 = inlined_call_operand.vmem [shape: f32[1,32], index: 9, kind: input, shape index: {}]   ;;  %s2830_s10 = inlined_call_operand.hbm [shape: f32[2,8,32], index: 10, kind: output, shape index: {}]  }
   0x1   :  { %2840 = sst [smem:[#allocation21_spill]] %s2822_s2 }
   0x2   :  { %2841 = sst [smem:[#allocation22_spill]] %s2823_s3 }
   0x3   :  { %15 = vsyncpa [#allocation3], 0 }
   0x4   :  { %17 = vsyncpa [#allocation3 + $0x1], 0 }
   0x5   :  { %18 = vsyncpa [#allocation6], 0 }
   0x6   :  { %20 = vsyncpa [#allocation6 + $0x1], 0 }
   0x7   :  { %21 = vsyncpa [#allocation9], 0 }
   0x8   :  { %22 = vsyncpa [#allocation4], 0 }
   0x9   :  { %24 = vsyncpa [#allocation4 + $0x1], 0  ;;  %s2363_s13 = smov 0   ;;  %s2365_s14 = smov 0  }
   0xa   :  { %s2367_s15 = smov 0   ;;  %s2369_s16 = smov 0  }
   0xb LB: > { %2842 = sst [smem:[#allocation16_spill]] %s2276_s13  ;;  %s2384_s17 = sadd.s32 4294967295, %s2288_s16   ;;  %s2288_s16 = sphi %s2369_s16, %s2867_s16   ;;  %s2284_s15 = sphi %s2367_s15, %s2869_s15   ;;  %s2280_s14 = sphi %s2365_s14, %s2871_s14   ;;  %s2276_s13 = sphi %s2363_s13, %s2870_s13  }
   0xc   : > { %2843 = sst [smem:[#allocation17_spill]] %s2284_s15  ;;  %s1839_s18 = sadd.s32 4294967294, %s2288_s16  }
   0xd   : > { %p50_p0 = scmp.ne.s32.totalorder %s2280_s14, %s2276_s13  ;;  %p2831_p1 = scmp.eq.s32.totalorder %s2384_s17, 0 }
   0xe   : > { %p274_p3 = scmp.eq.s32.totalorder %s1839_s18, 1  ;;  %p1840_p5 = scmp.ge.s32.totalorder %s2288_s16, 1 }
   0xf   : > { %p2393_p4 = por %p2831_p1, %p50_p0  ;;  %p281_p7 = scmp.lt.s32.totalorder %s2288_s16, 3 }
  0x10   : > { %p2398_p6 = por %p274_p3, %p50_p0  ;;  %s2290_s22 = smov [#allocation7]  }
  0x11   : > { %s2844_s19 = scalar_select %p2393_p4, 1, 0 }
  0x12   : > { %s2845_s20 = scalar_select %p2398_p6, 1, 0 }
  0x13   : > { %p2403_p8 = pnand %p1840_p5, %p281_p7  ;;  %s293_s23 = sshll.u32 %s2290_s22, 4  ;;  %s2407_s23 = int_to_ptr.vmem [resolvable:$true] %s293_s23 }
  0x14   : > { %2846 = sst [smem:[#allocation18_spill]] %s2845_s20  ;;  %s2291_s25 = smov [#allocation8]  }
  0x15   : > { %s2847_s21 = scalar_select %p2403_p8, 1, 0 }
  0x16   : > { %p1999_p9 = pneg %p2403_p8  ;;  %s306_s26 = sshll.u32 %s2291_s25, 4  ;;  %s2418_s26 = int_to_ptr.vmem [resolvable:$true] %s306_s26 }
  0x17   : > { %s2849_s2 = sld [smem:[#allocation21_spill]] }
  0x18   : > { %p2414_p11 = pnand %p1999_p9, %p2831_p1 }
  0x1a   : > { %p2096_p13 = pneg %p2414_p11 }
  0x1d   : > { %s2094_s29 = scalar_lea.hbm %s2849_s2, 256 }
  0x1e   : > { %p2095_p12 = scmp.ne.s32.totalorder %s2849_s2, %s2094_s29  ;;  %p2101_p5 = scmp.lt.u32.totalorder %s2094_s29, %s2849_s2 }
  0x20   : > { %p2097_p0 = pnand %p2096_p13, %p2095_p12 }
  0x22   : > { %p2098_p3 = pneg %p2097_p0 }
  0x24   : > { %p2103_p7 = pnand %p2101_p5, %p2098_p3 }
  0x26   : > { %2106 = shalt.err (!%p2103_p7)
}
  0x27   : > { %s2107_s22 = scalar_lea.vmem %s2407_s23, 256  ;;  %p2115_p2 = scmp.lt.s32.totalorder %s2407_s23, %s2407_s23 }
  0x28   : > { %p2108_p9 = scmp.ne.s32.totalorder %s2407_s23, %s2107_s22  ;;  %p2116_p12 = scmp.lt.s32.totalorder %s2107_s22, %s2107_s22 }
  0x2a   : > { %p2110_p10 = pnand %p2108_p9, %p2096_p13  ;;  %p2117_p0 = por %p2116_p12, %p2115_p2 }
  0x2c   : > { %p2111_p1 = pneg %p2110_p10 }
  0x2e   : > { %p2118_p6 = pnand %p2117_p0, %p2111_p1 }
  0x30   : > { %2121 = shalt.err (!%p2118_p6)
}
  0x31   : > { %s2292_s25 = smov 64   ;;  %s2293_s27 = smov 4  }
  0x32   : > { %2002 = dma.hbm_to_vmem [thread:$0]  (!%p2414_p11), %s2849_s2, 256, %s2407_s23, [#allocation6], %s2292_s25, %s2292_s25, %s2293_s27  }
  0x33   : > { %s2850_s3 = sld [smem:[#allocation22_spill]] }
  0x39   : > { %s2122_s12 = scalar_lea.hbm %s2850_s3, 256 }
  0x3a   : > { %p2123_p2 = scmp.ne.s32.totalorder %s2850_s3, %s2122_s12  ;;  %p2129_p10 = scmp.lt.u32.totalorder %s2122_s12, %s2850_s3 }
  0x3c   : > { %p2125_p1 = pnand %p2123_p2, %p2096_p13 }
  0x3e   : > { %p2126_p6 = pneg %p2125_p1 }
  0x40   : > { %p2131_p3 = pnand %p2129_p10, %p2126_p6 }
  0x42   : > { %2134 = shalt.err (!%p2131_p3)
}
  0x43   : > { %s2135_s23 = scalar_lea.vmem %s2418_s26, 256  ;;  %p2143_p12 = scmp.lt.s32.totalorder %s2418_s26, %s2418_s26 }
  0x44   : > { %p2136_p5 = scmp.ne.s32.totalorder %s2418_s26, %s2135_s23  ;;  %p2144_p0 = scmp.lt.s32.totalorder %s2135_s23, %s2135_s23 }
  0x46   : > { %p2138_p7 = pnand %p2136_p5, %p2096_p13  ;;  %p2145_p2 = por %p2144_p0, %p2143_p12 }
  0x48   : > { %p2139_p9 = pneg %p2138_p7 }
  0x4a   : > { %p2146_p1 = pnand %p2145_p2, %p2139_p9 }
  0x4c   : > { %2149 = shalt.err (!%p2146_p1)
}
  0x4d   : > { %2005 = dma.hbm_to_vmem [thread:$0]  (!%p2414_p11), %s2850_s3, 256, %s2418_s26, [#allocation9], %s2292_s25, %s2292_s25, %s2293_s27  }
  0x4e   : > { %s2473_s28 = sadd.s32 1, %s2288_s16   ;;  %s37_s24 = sadd.s32 1, %s2284_s15 }
  0x4f   : > { %2851 = sst [smem:[#allocation19_spill]] %s2473_s28  ;;  %s34_s29 = ssub.s32 %s2288_s16, %s2473_s28 }
  0x50   : > { %p44_p13 = scmp.ne.s32.totalorder %s2284_s15, %s2280_s14  ;;  %p35_p6 = scmp.eq.s32.totalorder %s34_s29, 0 }
  0x51   : > { %p45_p10 = scmp.eq.s32.totalorder %s2288_s16, 0  ;;  %p2852_p3 = scmp.eq.s32.totalorder %s2384_s17, 1 }
  0x52   : > { %p2019_p7 = scmp.lt.s32.totalorder %s2288_s16, 2  ;;  %s338_s12 = sand.u32 1, %s2284_s15  }
  0x53   : > { %p2483_p5 = por %p2852_p3, %p44_p13  ;;  %p46_p9 = por %p45_p10, %p44_p13 }
  0x54   : > { %s2489_s11 = scalar_select %p35_p6, %s2284_s15, %s37_s24  }
  0x55   : > { %s2853_s30 = scalar_select %p2483_p5, 1, 0 }
  0x56   : > { %2854 = sst [smem:[#allocation20_spill]] %s2489_s11  ;;  %s2492_s26 = sshll.u32 %s338_s12, 3 }
  0x57   : > { %s1845_s25 = sshll.u32 %s2288_s16, 7  ;;  %s342_s23 = scalar_lea.vmem [#allocation2], %s2492_s26 }
  0x58   : > { %s2498_s22 = scalar_lea.hbm %s2820_s0, %s1845_s25  ;;  %s349_s13 = sshll.u32 %s342_s23, 4  ;;  %s2501_s13 = int_to_ptr.vmem [resolvable:$true] %s349_s13 }
  0x59   : > { %p2503_p11 = pnand %p2019_p7, %p46_p9  ;;  %s2510_s27 = scalar_lea.hbm %s2821_s1, %s1845_s25 }
  0x5a   : > { %s356_s18 = sand.u32 1, %s2288_s16   ;;  %s339_s2 = scalar_lea.sflag [#allocation3], %s338_s12 }
  0x5b   : > { %s2150_s3 = scalar_lea.hbm %s2498_s22, 128  ;;  %p2152_p0 = pneg %p2503_p11 }
  0x5c   : > { %p2151_p12 = scmp.ne.s32.totalorder %s2498_s22, %s2150_s3  ;;  %s2155_s15 = scalar_lea.hbm %s2820_s0, 256 }
  0x5d   : > { %p2156_p13 = scmp.lt.u32.totalorder %s2498_s22, %s2820_s0  ;;  %p2157_p6 = scmp.lt.u32.totalorder %s2155_s15, %s2150_s3 }
  0x5e   : > { %p2153_p2 = pnand %p2152_p0, %p2151_p12  ;;  %p2159_p3 = scmp.lt.u32.totalorder %s2150_s3, %s2498_s22 }
  0x5f   : > { %p2158_p10 = por %p2157_p6, %p2156_p13 }
  0x60   : > { %p2154_p1 = pneg %p2153_p2 }
  0x61   : > { %p2160_p7 = por %p2159_p3, %p2158_p10 }
  0x63   : > { %p2161_p9 = pnand %p2160_p7, %p2154_p1 }
  0x65   : > { %2164 = shalt.err (!%p2161_p9)
}
  0x66   : > { %s2165_s12 = scalar_lea.vmem %s2501_s13, 128  ;;  %s2294_s11 = smov [#allocation2]  }
  0x67   : > { %p2166_p12 = scmp.ne.s32.totalorder %s2501_s13, %s2165_s12  ;;  %s2170_s25 = sshll.u32 %s2294_s11, 4  ;;  %s2171_s25 = int_to_ptr.vmem [resolvable:$false] %s2170_s25 }
  0x68   : > { %s2172_s28 = scalar_lea.vmem %s2171_s25, 256  ;;  %p2173_p4 = scmp.lt.s32.totalorder %s2501_s13, %s2171_s25 }
  0x69   : > { %p2168_p2 = pnand %p2166_p12, %p2152_p0  ;;  %p2174_p13 = scmp.lt.s32.totalorder %s2172_s28, %s2165_s12 }
  0x6b   : > { %p2169_p5 = pneg %p2168_p2  ;;  %p2175_p6 = por %p2174_p13, %p2173_p4 }
  0x6d   : > { %p2176_p10 = pnand %p2175_p6, %p2169_p5 }
  0x6f   : > { %2179 = shalt.err (!%p2176_p10)
}
  0x70   : > { %2009 = dma.hbm_to_vmem [thread:$0]  (!%p2503_p11), %s2498_s22, 128, %s2501_s13, %s339_s2  }
  0x71   : > { %s360_s3 = scalar_lea.vmem [#allocation5], %s2492_s26  ;;  %s357_s29 = scalar_lea.sflag [#allocation6], %s356_s18 }
  0x72   : > { %s367_s15 = sshll.u32 %s360_s3, 4  ;;  %s2180_s23 = scalar_lea.hbm %s2510_s27, 128  ;;  %s368_s15 = int_to_ptr.vmem [resolvable:$true] %s367_s15 }
  0x73   : > { %p2181_p4 = scmp.ne.s32.totalorder %s2510_s27, %s2180_s23  ;;  %s2185_s11 = scalar_lea.hbm %s2821_s1, 256 }
  0x74   : > { %p2186_p3 = scmp.lt.u32.totalorder %s2510_s27, %s2821_s1  ;;  %p2187_p7 = scmp.lt.u32.totalorder %s2185_s11, %s2180_s23 }
  0x75   : > { %p2183_p5 = pnand %p2181_p4, %p2152_p0  ;;  %p2189_p12 = scmp.lt.u32.totalorder %s2180_s23, %s2510_s27 }
  0x76   : > { %p2188_p9 = por %p2187_p7, %p2186_p3 }
  0x77   : > { %p2184_p1 = pneg %p2183_p5 }
  0x78   : > { %p2190_p2 = por %p2189_p12, %p2188_p9 }
  0x7a   : > { %p2191_p13 = pnand %p2190_p2, %p2184_p1 }
  0x7c   : > { %2194 = shalt.err (!%p2191_p13)
}
  0x7d   : > { %s2195_s2 = scalar_lea.vmem %s368_s15, 128  ;;  %s2295_s26 = smov [#allocation5]  }
  0x7e   : > { %p2196_p6 = scmp.ne.s32.totalorder %s368_s15, %s2195_s2  ;;  %s2200_s22 = sshll.u32 %s2295_s26, 4  ;;  %s2201_s22 = int_to_ptr.vmem [resolvable:$false] %s2200_s22 }
  0x7f   : > { %s2202_s13 = scalar_lea.vmem %s2201_s22, 256  ;;  %p2203_p5 = scmp.lt.s32.totalorder %s368_s15, %s2201_s22 }
  0x80   : > { %p2198_p10 = pnand %p2196_p6, %p2152_p0  ;;  %p2204_p8 = scmp.lt.s32.totalorder %s2202_s13, %s2195_s2 }
  0x82   : > { %p2199_p4 = pneg %p2198_p10  ;;  %p2205_p3 = por %p2204_p8, %p2203_p5 }
  0x84   : > { %p2206_p7 = pnand %p2205_p3, %p2199_p4 }
  0x86   : > { %2209 = shalt.err (!%p2206_p7)
}
  0x87   : > { %2012 = dma.hbm_to_vmem [thread:$0]  (!%p2503_p11), %s2510_s27, 128, %s368_s15, %s357_s29  }
  0x88   : > { %p2856_p1 = scmp.ne.s32.totalorder %s2847_s21, 0 }
  0x89   : > { %s2563_s18 = sand.u32 (!%p2856_p1), 1, %s2280_s14   ;;  %p2857_p8 = scmp.ne.s32.totalorder (!%p2856_p1), %s2844_s19, 0 }
  0x8a   : > { %376 = sbr.rel (%p2856_p1) target bundleno = 1850 (0x73a), region = 60  ;;  %s2566_s3 = sshll.u32 (!%p2856_p1), %s2563_s18, 3 }
  0x8b   : > { %s379_s23 = scalar_lea.sflag (!%p2856_p1), [#allocation3], %s2563_s18  ;;  %s382_s24 = scalar_lea.vmem (!%p2856_p1), [#allocation2], %s2566_s3 }
  0x91   : > { %2255 = dma.done.wait (%p2857_p8), %s379_s23, 128  }
  0x92   : > { %2257 = vsyncadd (%p2857_p8), %s379_s23, 4294967168  ;;  %s387_s21 = sand.u32 1, %s2384_s17   ;;  %s391_s27 = scalar_lea.vmem [#allocation5], %s2566_s3 }
  0x93   : > { %s388_s20 = scalar_lea.sflag [#allocation6], %s387_s21 }
  0x94   : > { %2259 = dma.done.wait (%p2857_p8), %s388_s20, 128  }
  0x95   : > { %2261 = vsyncadd (%p2857_p8), %s388_s20, 4294967168  ;;  %p2858_p11 = scmp.eq.s32.totalorder %s2384_s17, 0 }
  0x97   : > { %2263 = dma.done.wait (%p2858_p11), [#allocation6], 256   ;;  %p2859_p0 = pmov %p2858_p11 }
  0x99   : > { %2265 = vsyncadd (%p2859_p0), [#allocation6], 4294967040  ;;  %p2860_p9 = pmov %p2859_p0 }
  0x9a   : > { %p2861_p12 = pmov %p2859_p0 }
  0x9b   : > { %2267 = dma.done.wait (%p2860_p9), [#allocation9], 256  }
  0x9c   : > { %2269 = vsyncadd (%p2861_p12), [#allocation9], 4294967040  ;;  %v2296_v0 = vmov 0.0   ;;  %vm2297_vm0 = vmmov 0   ;;  %v2070_v1 = vld [vmem:[#allocation8] sm:$0xff]   ;;  %v2071_v2 = vld [vmem:[#allocation7] sm:$0xff]   ;;  %v594_v23 = vlaneseq }
  0x9d   : > { %1921 = vmatprep.subr.bf16.mxu1 %v2296_v0  ;;  %1913 = vmatprep.subr.bf16.mxu0 %v2296_v0  ;;  %v2072_v3 = vld [vmem:[#allocation8 + $0x8] sm:$0xff]   ;;  %v2073_v5 = vld [vmem:[#allocation7 + $0x8] sm:$0xff]   ;;  %vm468_vm1 = vcmask 261120   ;;  %v1858_v9 = vld [vmem:[%s2825_s5] ss:$0 sm:$0xff]  ;;  %s2298_s11 = smov 104  }
  0x9e   : > { %1925 = vmatprep.mubr.msk.bf16.mxu1 %vm2297_vm0, %v2296_v0  ;;  %1917 = vmatprep.mubr.msk.bf16.mxu0 %vm2297_vm0, %v2296_v0  ;;  %v443_v4 = vld [vmem:[%s391_s27] sm:$0xff]  ;;  %v2596_v6 = vld [vmem:[%s382_s24] sm:$0xff]  ;;  %s2299_s25 = smov 120   ;;  %s2300_s28 = smov 112   ;;  %v2302_v21 = vmov 1983009808  }
  0x9f   : > { %1922 = vmatpush3.bf16.msra.mxu1 %v2070_v1  ;;  %1914 = vmatpush3.bf16.msra.mxu0 %v2071_v2  ;;  %v512_v7 = vpack.c.bf16 %v443_v4, %v443_v4  ;;  %v444_v8 = vpack.c.bf16 %v2596_v6, %v2596_v6  ;;  %v1854_v11 = vld [vmem:[%s2824_s4] ss:$0 sm:$0xff]  ;;  %s2301_s2 = smov 96   ;;  %v592_v22 = vunpack.c.l.s4 %v2302_v21  ;;  %v2303_v24 = vmov 1934713408   ;;  %s2304_s24 = smov 16  }
  0xa0   : > { %1923 = vmatprep.subr.bf16.mxu1 %v2296_v0  ;;  %1915 = vmatprep.subr.bf16.mxu0 %v2296_v0  ;;  %v624_v25 = vunpack.c.l.s4 %v2303_v24  ;;  %v595_v27 = vshrl.u32 %v594_v23, 7  ;;  %vm1027_vm2 = vcmask 64512   ;;  %vm1275_vm3 = vcmask 1043456   ;;  %s2305_s21 = smov 8   ;;  %s2306_s20 = smov 24  }
  0xa1   : > { %v593_v26 = vunpack.c.0.s8 %v592_v22  ;;  %vm1610_vm4 = vcmask 130048   ;;  %vm1612_vm5 = vcmask 195584   ;;  %s1714_s23 = scalar_lea.sflag [#allocation4], %s2563_s18  ;;  %p2862_p13 = scmp.ne.s32.totalorder %s2853_s30, 0 }
  0xa2   : > { %v625_v30 = vunpack.c.0.s8 %v624_v25 }
  0xa3   : > { %1924 = vmatpush3.bf16.msra.mxu1 %v2072_v3  ;;  %1916 = vmatpush3.bf16.msra.mxu0 %v2073_v5  ;;  %v2618_v31 = vsub.s32 %v593_v26, %v595_v27 }
  0xa4   : > { %1935 = vmatprep.subr.bf16.mxu1 %v2296_v0  ;;  %1929 = vmatprep.subr.bf16.mxu0 %v2296_v0  ;;  %v2626_v38 = vsub.s32 %v625_v30, %v595_v27 }
  0xa6   : > { %1926 = vmatmul.mubr.msk.bf16.vlgmr.msra.gmra.mrb[0].mxu1 %vm468_vm1, %v512_v7  ;;  %1918 = vmatmul.mubr.msk.bf16.vlgmr.msra.gmra.mrb[0].mxu0 %vm468_vm1, %v444_v8 }
  0xa7   : > { %1937 = vmatprep.mubr.msk.bf16.mxu1 %vm2297_vm0, %v2296_v0  ;;  %1931 = vmatprep.mubr.msk.bf16.mxu0 %vm2297_vm0, %v2296_v0 }
 0x179   : > { %v573_v10 = vpop.f32.mrb[0].mxu1  ;;  %v506_v14 = vpop.f32.mrb[0].mxu0 }
 0x17a   : > { %v574_v12 = vadd.f32 %v1858_v9, %v573_v10  ;;  %v1927_v13 = vpop.f32.mrb[1].mxu1  ;;  %v1919_v16 = vpop.f32.mrb[1].mxu0  ;;  %v507_v18 = vadd.f32 %v1854_v11, %v506_v14 }
 0x17b   : > { %v576_v15 = vpop.f32.mrb[2].mxu1  ;;  %v509_v19 = vpop.f32.mrb[2].mxu0 }
 0x17c   : > { %732 = vrot.lane.b32.xlu1 %v574_v12, %s2298_s11  ;;  %726 = vrot.lane.b32.xlu0 %v574_v12, %s2299_s25  ;;  %v1928_v17 = vpop.f32.mrb[3].mxu1  ;;  %v1920_v20 = vpop.f32.mrb[3].mxu0 }
 0x180   : > { %729 = vrot.lane.b32.xlu0 %v574_v12, %s2300_s28  ;;  %580 = vrot.lane.b32.xlu1 %v507_v18, %s2299_s25  ;;  %s1885_s25 = sshll.u32 %s2384_s17, 7  ;;  %s2307_s17 = smov [#allocation10]  }
 0x181   : > { %s2775_s13 = scalar_lea.hbm %s2830_s10, %s1885_s25 }
 0x184   : > { %583 = vrot.lane.b32.xlu0 %v507_v18, %s2300_s28  ;;  %586 = vrot.lane.b32.xlu1 %v507_v18, %s2298_s11  ;;  %s440_s28 = scalar_lea.vmem [#allocation10], %s2566_s3  ;;  %s2214_s3 = sshll.u32 %s2307_s17, 4  ;;  %s2215_s3 = int_to_ptr.vmem [resolvable:$false] %s2214_s3 }
 0x188   : > { %871 = vrot.lane.b32.xlu0 %v574_v12, %s2301_s2 }
 0x1ee   : > { %v2615_v28 = vpop.permute.xlu1 %732  ;;  %v727_v29 = vpop.permute.xlu0 %726 }
 0x1ef   : > { %873 = vrot.lane.b32.xlu1 %v727_v29, %s2301_s2  ;;  %v751_v32 = vcombine.low %v727_v29, %v2615_v28  ;;  %v752_v33 = vcombine.high %v727_v29, %v2615_v28 }
 0x1f1   : > { %v759_v39 = vrot.slane %v751_v32, %v2618_v31  ;;  %v766_v40 = vrot.slane %v752_v33, %v2618_v31 }
 0x1f2   : > { %v2622_v34 = vpop.permute.xlu0 %729  ;;  %v581_v35 = vpop.permute.xlu1 %580 }
 0x1f3   : > { %v735_v36 = vcombine.low %v574_v12, %v2622_v34  ;;  %v736_v37 = vcombine.high %v574_v12, %v2622_v34 }
 0x1f5   : > { %v743_v41 = vrot.slane %v735_v36, %v2618_v31  ;;  %v750_v42 = vrot.slane %v736_v37, %v2618_v31 }
 0x1f6   : > { %v584_v43 = vpop.permute.xlu0 %583  ;;  %v587_v44 = vpop.permute.xlu1 %586 }
 0x1f7   : > { %v767_v45 = vcombine.low %v743_v41, %v759_v39  ;;  %v768_v46 = vcombine.high %v743_v41, %v759_v39  ;;  %v783_v47 = vcombine.low %v750_v42, %v766_v40  ;;  %v784_v48 = vcombine.high %v750_v42, %v766_v40 }
 0x1f8   : > { %v589_v49 = vcombine.low %v507_v18, %v584_v43  ;;  %v590_v50 = vcombine.high %v507_v18, %v584_v43  ;;  %v605_v51 = vcombine.low %v581_v35, %v587_v44  ;;  %v606_v52 = vcombine.high %v581_v35, %v587_v44 }
 0x1f9   : > { %v775_v53 = vrot.slane %v767_v45, %v2626_v38  ;;  %v782_v54 = vrot.slane %v768_v46, %v2626_v38  ;;  %v791_v55 = vrot.slane %v783_v47, %v2626_v38  ;;  %v798_v56 = vrot.slane %v784_v48, %v2626_v38 }
 0x1fa   : > { %v597_v57 = vrot.slane %v589_v49, %v2618_v31  ;;  %v604_v58 = vrot.slane %v590_v50, %v2618_v31  ;;  %v613_v59 = vrot.slane %v605_v51, %v2618_v31  ;;  %v620_v60 = vrot.slane %v606_v52, %v2618_v31 }
 0x1fb   : > { %v803_v61 = vcombine.low %v775_v53, %v782_v54  ;;  %v1864_v62 = vcombine.high %v775_v53, %v782_v54  ;;  %v819_v63 = vcombine.low %v791_v55, %v798_v56  ;;  %v1865_v1 = vcombine.high %v791_v55, %v798_v56 }
 0x1fc   : > { %v621_v2 = vcombine.low %v597_v57, %v613_v59  ;;  %v622_v3 = vcombine.high %v597_v57, %v613_v59  ;;  %v637_v4 = vcombine.low %v604_v58, %v620_v60  ;;  %v638_v5 = vcombine.high %v604_v58, %v620_v60 }
 0x1fd   : > { %v810_v7 = vrot.slane %v803_v61, %v2618_v31  ;;  %v818_v8 = vrot.slane %v1864_v62, %v2618_v31  ;;  %v826_v9 = vrot.slane %v819_v63, %v2618_v31  ;;  %v834_v10 = vrot.slane %v1865_v1, %v2618_v31 }
 0x1fe   : > { %v629_v11 = vrot.slane %v621_v2, %v2626_v38  ;;  %v636_v12 = vrot.slane %v622_v3, %v2626_v38  ;;  %v645_v13 = vrot.slane %v637_v4, %v2626_v38  ;;  %v652_v14 = vrot.slane %v638_v5, %v2626_v38 }
 0x1ff   : > { %v835_v15 = vcombine.low %v810_v7, %v818_v8  ;;  %v851_v16 = vcombine.low %v826_v9, %v834_v10  ;;  %v836_v17 = vcombine.high %v810_v7, %v818_v8  ;;  %v852_v18 = vcombine.high %v826_v9, %v834_v10 }
 0x200   : > { %v657_v19 = vcombine.low %v629_v11, %v636_v12  ;;  %v1862_v20 = vcombine.high %v629_v11, %v636_v12  ;;  %v673_v21 = vcombine.low %v645_v13, %v652_v14  ;;  %v1863_v22 = vcombine.high %v645_v13, %v652_v14 }
 0x201   : > { %v843_v23 = vrot.slane %v835_v15, %v2626_v38  ;;  %v859_v24 = vrot.slane %v851_v16, %v2626_v38  ;;  %v850_v33 = vrot.slane %v836_v17, %v2626_v38  ;;  %v866_v35 = vrot.slane %v852_v18, %v2626_v38 }
 0x202   : > { %v664_v25 = vrot.slane %v657_v19, %v2618_v31  ;;  %v672_v26 = vrot.slane %v1862_v20, %v2618_v31  ;;  %v680_v27 = vrot.slane %v673_v21, %v2618_v31  ;;  %v688_v29 = vrot.slane %v1863_v22, %v2618_v31  ;;  %v872_v21 = vpop.permute.xlu0 %871 }
 0x203   : > { %v867_v30 = vcombine.low %v843_v23, %v859_v24  ;;  %v868_v32 = vcombine.high %v843_v23, %v859_v24  ;;  %v869_v45 = vcombine.low %v850_v33, %v866_v35  ;;  %v870_v46 = vcombine.high %v850_v33, %v866_v35 }
 0x204   : > { %v689_v36 = vcombine.low %v664_v25, %v672_v26  ;;  %v705_v37 = vcombine.low %v680_v27, %v688_v29  ;;  %v690_v47 = vcombine.high %v664_v25, %v672_v26  ;;  %v706_v48 = vcombine.high %v680_v27, %v688_v29 }
 0x205   : > { %v1023_v39 = vpack.c.bf16 %v867_v30, %v867_v30  ;;  %v1024_v40 = vpack.c.bf16 %v868_v32, %v868_v32  ;;  %v1025_v51 = vpack.c.bf16 %v869_v45, %v869_v45  ;;  %v1026_v52 = vpack.c.bf16 %v870_v46, %v870_v46 }
 0x206   : > { %v697_v41 = vrot.slane %v689_v36, %v2626_v38  ;;  %v713_v42 = vrot.slane %v705_v37, %v2626_v38  ;;  %v704_v55 = vrot.slane %v690_v47, %v2626_v38  ;;  %v720_v56 = vrot.slane %v706_v48, %v2626_v38 }
 0x207   : > { %v1032_v43 = vsel %vm1027_vm2, %v1023_v39, 0  ;;  %v1078_v44 = vsel %vm1027_vm2, %v1024_v40, 0  ;;  %v1124_v57 = vsel %vm1027_vm2, %v1025_v51, 0  ;;  %v1170_v58 = vsel %vm1027_vm2, %v1026_v52, 0 }
 0x208   : > { %1930 = vmatpush3.bf16.xpose.msra.mxu0 %v1032_v43  ;;  %1936 = vmatpush3.bf16.xpose.msra.mxu1 %v1078_v44  ;;  %v721_v49 = vcombine.low %v697_v41, %v713_v42  ;;  %v722_v50 = vcombine.high %v697_v41, %v713_v42  ;;  %v723_v59 = vcombine.low %v704_v55, %v720_v56 }
 0x209   : > { %1941 = vmatprep.subr.bf16.mxu0 %v2296_v0  ;;  %1947 = vmatprep.subr.bf16.mxu1 %v2296_v0  ;;  %v724_v60 = vcombine.high %v704_v55, %v720_v56 }
 0x20a   : > { %v1019_v53 = vpack.c.bf16 %v721_v49, %v721_v49  ;;  %v1020_v54 = vpack.c.bf16 %v722_v50, %v722_v50  ;;  %v1021_v61 = vpack.c.bf16 %v723_v59, %v723_v59 }
 0x20b   : > { %v1022_v62 = vpack.c.bf16 %v724_v60, %v724_v60 }
 0x20f   : > { %1932 = vmatmul.mubr.msk.bf16.vlgmr.msra.gmra.mrb[4].mxu0 %vm1027_vm2, %v1019_v53  ;;  %1938 = vmatmul.mubr.msk.bf16.vlgmr.msra.gmra.mrb[4].mxu1 %vm1027_vm2, %v1020_v54 }
 0x210   : > { %1942 = vmatpush3.bf16.xpose.msra.mxu0 %v1124_v57  ;;  %1948 = vmatpush3.bf16.xpose.msra.mxu1 %v1170_v58 }
 0x211   : > { %1943 = vmatprep.mubr.msk.bf16.mxu0 %vm2297_vm0, %v2296_v0  ;;  %1949 = vmatprep.mubr.msk.bf16.mxu1 %vm2297_vm0, %v2296_v0 }
 0x212   : > { %1953 = vmatprep.subr.bf16.mxu0 %v2296_v0  ;;  %1959 = vmatprep.subr.bf16.mxu1 %v2296_v0 }
 0x217   : > { %1944 = vmatmul.mubr.msk.bf16.vlgmr.msra.gmra.mrb[8].mxu0 %vm1027_vm2, %v1021_v61  ;;  %1950 = vmatmul.mubr.msk.bf16.vlgmr.msra.gmra.mrb[8].mxu1 %vm1027_vm2, %v1022_v62 }
 0x218   : > { %1955 = vmatprep.mubr.msk.bf16.mxu0 %vm2297_vm0, %v2296_v0  ;;  %1961 = vmatprep.mubr.msk.bf16.mxu1 %vm2297_vm0, %v2296_v0 }
 0x261   : > { %v874_v22 = vpop.permute.xlu1 %873 }
 0x2e2   : > { %v1068_v63 = vpop.f32.mrb[4].mxu0  ;;  %v1114_v1 = vpop.f32.mrb[4].mxu1 }
 0x2e3   : > { %v1933_v2 = vpop.f32.mrb[5].mxu0  ;;  %v1939_v3 = vpop.f32.mrb[5].mxu1  ;;  %v1215_v4 = vsel %vm1027_vm2, %v1114_v1, -inf  ;;  %v1212_v5 = vsel %vm1027_vm2, %v1068_v63, -inf }
 0x2e4   : > { %1216 = vmax.xlane.f32.xlu1 %v1215_v4  ;;  %v1117_v7 = vpop.f32.mrb[6].mxu1  ;;  %1213 = vmax.xlane.f32.xlu0 %v1212_v5  ;;  %v1071_v8 = vpop.f32.mrb[6].mxu0 }
 0x2e5   : > { %v1934_v9 = vpop.f32.mrb[7].mxu0  ;;  %v1940_v10 = vpop.f32.mrb[7].mxu1 }
 0x2ea   : > { %v2682_v11 = vpop.f32.mrb[8].mxu0  ;;  %v2684_v12 = vpop.f32.mrb[8].mxu1 }
 0x2eb   : > { %v1945_v13 = vpop.f32.mrb[9].mxu0  ;;  %v1951_v14 = vpop.f32.mrb[9].mxu1  ;;  %v1221_v19 = vsel %vm1027_vm2, %v2684_v12, -inf  ;;  %v1218_v20 = vsel %vm1027_vm2, %v2682_v11, -inf }
 0x2ec   : > { %v1163_v15 = vpop.f32.mrb[10].mxu0  ;;  %v1209_v16 = vpop.f32.mrb[10].mxu1 }
 0x2ed   : > { %v1946_v17 = vpop.f32.mrb[11].mxu0  ;;  %v1952_v18 = vpop.f32.mrb[11].mxu1 }
 0x2f5   : > { %877 = vrot.lane.b32.xlu1 %v2615_v28, %s2301_s2 }
 0x2fa   : > { %875 = vrot.lane.b32.xlu0 %v2622_v34, %s2301_s2  ;;  %s1727_s2 = sshll.u32 %s440_s28, 4  ;;  %s2777_s2 = int_to_ptr.vmem [resolvable:$true] %s1727_s2 }
 0x2fb   : > { %p2217_p4 = scmp.lt.s32.totalorder %s2777_s2, %s2215_s3 }
 0x319   : > { %1222 = vmax.xlane.f32.xlu1 %v1221_v19  ;;  %1219 = vmax.xlane.f32.xlu0 %v1218_v20 }
 0x371   : > { %v1217_v23 = vpop.xlane.xlu1 %1216  ;;  %v1214_v24 = vpop.xlane.xlu0 %1213 }
 0x372   : > { %v1225_v25 = vsub.f32 %v1114_v1, %v1217_v23  ;;  %v1224_v26 = vsub.f32 %v1068_v63, %v1214_v24 }
 0x374   : > { %v1228_v27 = vmul.f32 1.442695, %v1224_v26  ;;  %v1230_v29 = vmul.f32 1.442695, %v1225_v25 }
 0x375   : > { %v878_v28 = vpop.permute.xlu1 %877  ;;  %v876_v30 = vpop.permute.xlu0 %875 }
 0x376   : > { %v899_v32 = vcombine.low %v874_v22, %v878_v28  ;;  %v900_v34 = vcombine.high %v874_v22, %v878_v28  ;;  %v883_v33 = vcombine.low %v872_v21, %v876_v30  ;;  %2076 = vpow2.f32 %v1228_v27 }
 0x377   : > { %v884_v35 = vcombine.high %v872_v21, %v876_v30  ;;  %2078 = vpow2.f32 %v1230_v29 }
 0x378   : > { %v907_v36 = vrot.slane %v899_v32, %v2618_v31  ;;  %v914_v37 = vrot.slane %v900_v34, %v2618_v31  ;;  %v891_v39 = vrot.slane %v883_v33, %v2618_v31 }
 0x379   : > { %v898_v40 = vrot.slane %v884_v35, %v2618_v31 }
 0x37a   : > { %v915_v41 = vcombine.low %v891_v39, %v907_v36  ;;  %v916_v42 = vcombine.high %v891_v39, %v907_v36 }
 0x37b   : > { %v931_v43 = vcombine.low %v898_v40, %v914_v37  ;;  %v932_v44 = vcombine.high %v898_v40, %v914_v37 }
 0x37c   : > { %v923_v45 = vrot.slane %v915_v41, %v2626_v38  ;;  %v930_v46 = vrot.slane %v916_v42, %v2626_v38 }
 0x37d   : > { %v939_v47 = vrot.slane %v931_v43, %v2626_v38  ;;  %v946_v48 = vrot.slane %v932_v44, %v2626_v38 }
 0x37e   : > { %v951_v49 = vcombine.low %v923_v45, %v930_v46  ;;  %v1866_v50 = vcombine.high %v923_v45, %v930_v46 }
 0x37f   : > { %v967_v51 = vcombine.low %v939_v47, %v946_v48  ;;  %v1867_v52 = vcombine.high %v939_v47, %v946_v48 }
 0x380   : > { %v958_v53 = vrot.slane %v951_v49, %v2618_v31  ;;  %v966_v54 = vrot.slane %v1866_v50, %v2618_v31  ;;  %v2077_v55 = vpop.eup %2076 }
 0x381   : > { %v974_v56 = vrot.slane %v967_v51, %v2618_v31  ;;  %v982_v57 = vrot.slane %v1867_v52, %v2618_v31  ;;  %v1236_v58 = vsel %vm1027_vm2, %v2077_v55, 0.0  ;;  %v2079_v61 = vpop.eup %2078  ;;  %v1264_v19 = vpack.c.bf16 %v2077_v55, %v2077_v55 }
 0x382   : > { %v983_v59 = vcombine.low %v958_v53, %v966_v54  ;;  %v984_v60 = vcombine.high %v958_v53, %v966_v54  ;;  %1237 = vadd.xlane.f32.xlu0 %v1236_v58  ;;  %v1239_v5 = vsel %vm1027_vm2, %v2079_v61, 0.0  ;;  %v1265_v20 = vpack.c.bf16 %v2079_v61, %v2079_v61 }
 0x383   : > { %v999_v62 = vcombine.low %v974_v56, %v982_v57  ;;  %v1000_v63 = vcombine.high %v974_v56, %v982_v57 }
 0x384   : > { %v991_v1 = vrot.slane %v983_v59, %v2626_v38  ;;  %v998_v2 = vrot.slane %v984_v60, %v2626_v38 }
 0x385   : > { %v1007_v3 = vrot.slane %v999_v62, %v2626_v38  ;;  %v1014_v4 = vrot.slane %v1000_v63, %v2626_v38 }
 0x386   : > { %1240 = vadd.xlane.f32.xlu0 %v1239_v5 }
 0x387   : > { %v1015_v7 = vcombine.low %v991_v1, %v1007_v3  ;;  %v1016_v8 = vcombine.high %v991_v1, %v1007_v3  ;;  %v1017_v9 = vcombine.low %v998_v2, %v1014_v4  ;;  %v1018_v10 = vcombine.high %v998_v2, %v1014_v4 }
 0x389   : > { %v1268_v13 = vpack.c.bf16 %v1015_v7, %v1015_v7  ;;  %v1269_v14 = vpack.c.bf16 %v1016_v8, %v1016_v8  ;;  %v1270_v17 = vpack.c.bf16 %v1017_v9, %v1017_v9  ;;  %v1271_v18 = vpack.c.bf16 %v1018_v10, %v1018_v10 }
 0x38b   : > { %v1277_v15 = vsel %vm1275_vm3, %v1268_v13, 0  ;;  %v1323_v16 = vsel %vm1275_vm3, %v1269_v14, 0  ;;  %v1369_v21 = vsel %vm1275_vm3, %v1270_v17, 0  ;;  %v1415_v22 = vsel %vm1275_vm3, %v1271_v18, 0 }
 0x38c   : > { %1954 = vmatpush3.bf16.msra.mxu0 %v1277_v15  ;;  %1960 = vmatpush3.bf16.msra.mxu1 %v1323_v16 }
 0x38d   : > { %1965 = vmatprep.subr.bf16.mxu0 %v2296_v0  ;;  %1971 = vmatprep.subr.bf16.mxu1 %v2296_v0 }
 0x38f   : > { %1956 = vmatmul.mubr.msk.bf16.vlgmr.msra.gmra.mrb[12].mxu0 %vm1027_vm2, %v1264_v19  ;;  %1962 = vmatmul.mubr.msk.bf16.vlgmr.msra.gmra.mrb[12].mxu1 %vm1027_vm2, %v1265_v20 }
 0x390   : > { %1966 = vmatpush3.bf16.msra.mxu0 %v1369_v21  ;;  %1972 = vmatpush3.bf16.msra.mxu1 %v1415_v22 }
 0x391   : > { %1967 = vmatprep.mubr.msk.bf16.mxu0 %vm2297_vm0, %v2296_v0  ;;  %1973 = vmatprep.mubr.msk.bf16.mxu1 %vm2297_vm0, %v2296_v0 }
 0x392   : > { %1977 = vmatprep.subr.bf16.mxu0 %v2296_v0 }
 0x3a6   : > { %v1223_v23 = vpop.xlane.xlu1 %1222  ;;  %v1220_v24 = vpop.xlane.xlu0 %1219 }
 0x3a7   : > { %v1227_v25 = vsub.f32 %v2684_v12, %v1223_v23  ;;  %v1226_v26 = vsub.f32 %v2682_v11, %v1220_v24 }
 0x3a9   : > { %v1234_v27 = vmul.f32 1.442695, %v1227_v25  ;;  %v1232_v29 = vmul.f32 1.442695, %v1226_v26 }
 0x3ab   : > { %2080 = vpow2.f32 %v1234_v27  ;;  %v2074_v27 = vld [vmem:[%s2826_s6] sm:$0xff]  }
 0x3ac   : > { %2082 = vpow2.f32 %v1232_v29 }
 0x3b5   : > { %v2081_v28 = vpop.eup %2080 }
 0x3b6   : > { %v2083_v30 = vpop.eup %2082  ;;  %v1245_v32 = vsel %vm1027_vm2, %v2081_v28, 0.0  ;;  %v1267_v34 = vpack.c.bf16 %v2081_v28, %v2081_v28 }
 0x3b7   : > { %1246 = vadd.xlane.f32.xlu0 %v1245_v32  ;;  %v1242_v33 = vsel %vm1027_vm2, %v2083_v30, 0.0  ;;  %v1266_v35 = vpack.c.bf16 %v2083_v30, %v2083_v30 }
 0x3b8   : > { %1243 = vadd.xlane.f32.xlu1 %v1242_v33  ;;  %1974 = vmatmul.mubr.msk.bf16.vlgmr.msra.gmra.mrb[16].mxu1 %vm1027_vm2, %v1267_v34 }
 0x3b9   : > { %1968 = vmatmul.mubr.msk.bf16.vlgmr.msra.gmra.mrb[16].mxu0 %vm1027_vm2, %v1266_v35 }
 0x3ba   : > { %1981 = vmatprep.mubr.msk.bf16.mxu0 %vm2297_vm0, %v2296_v0  ;;  %1978 = vmatpush3.bf16.msra.mxu0 %v2074_v27 }
 0x3bb   : > { %1979 = vmatprep.subr.bf16.mxu0 %v2296_v0 }
 0x40f   : > { %v1238_v43 = vpop.xlane.xlu0 %1237 }
 0x410   : > { %2084 = vrcp.f32 %v1238_v43 }
 0x413   : > { %v1241_v44 = vpop.xlane.xlu0 %1240 }
 0x414   : > { %2086 = vrcp.f32 %v1241_v44 }
 0x41a   : > { %v2085_v47 = vpop.eup %2084 }
 0x41b   : > { %v1252_v53 = vmul.f32 %v2085_v47, %v1238_v43 }
 0x41d   : > { %v1256_v57 = vsub.f32 2.0, %v1252_v53 }
 0x41e   : > { %v2087_v48 = vpop.eup %2086 }
 0x41f   : > { %v1253_v51 = vmul.f32 %v2087_v48, %v1241_v44  ;;  %v1260_v61 = vmul.f32 %v2085_v47, %v1256_v57  ;;  %v1878_v57 = vld [vmem:[%s2827_s7] ss:$0 sm:$0xff] }
 0x421   : > { %v1257_v55 = vsub.f32 2.0, %v1253_v51 }
 0x423   : > { %v1261_v59 = vmul.f32 %v2087_v48, %v1257_v55 }
 0x444   : > { %v1247_v45 = vpop.xlane.xlu0 %1246 }
 0x445   : > { %v1244_v46 = vpop.xlane.xlu1 %1243  ;;  %2088 = vrcp.f32 %v1247_v45 }
 0x446   : > { %2090 = vrcp.f32 %v1244_v46 }
 0x44f   : > { %v2089_v49 = vpop.eup %2088 }
 0x450   : > { %v2091_v50 = vpop.eup %2090  ;;  %v1255_v52 = vmul.f32 %v2089_v49, %v1247_v45 }
 0x451   : > { %v1254_v54 = vmul.f32 %v2091_v50, %v1244_v46 }
 0x452   : > { %v1259_v56 = vsub.f32 2.0, %v1255_v52 }
 0x453   : > { %v1258_v58 = vsub.f32 2.0, %v1254_v54 }
 0x454   : > { %v1263_v60 = vmul.f32 %v2089_v49, %v1259_v56 }
 0x455   : > { %v1262_v62 = vmul.f32 %v2091_v50, %v1258_v58 }
 0x462   : > { %v1313_v11 = vpop.f32.mrb[12].mxu0  ;;  %v1359_v12 = vpop.f32.mrb[12].mxu1 }
 0x463   : > { %v1957_v36 = vpop.f32.mrb[13].mxu0  ;;  %v1963_v37 = vpop.f32.mrb[13].mxu1  ;;  %v1458_v1 = vmul.f32 %v1359_v12, %v1261_v59  ;;  %v1457_v5 = vmul.f32 %v1313_v11, %v1260_v61  ;;  %v2075_v12 = vld [vmem:[%s2826_s6 + $0x8] sm:$0xff]  }
 0x464   : > { %v1316_v39 = vpop.f32.mrb[14].mxu0  ;;  %v1362_v40 = vpop.f32.mrb[14].mxu1  ;;  %1980 = vmatpush3.bf16.msra.mxu0 %v2075_v12 }
 0x465   : > { %v1958_v41 = vpop.f32.mrb[15].mxu0  ;;  %v1964_v42 = vpop.f32.mrb[15].mxu1 }
 0x48b   : > { %v1451_v63 = vpop.f32.mrb[16].mxu1 }
 0x48c   : > { %v1405_v2 = vpop.f32.mrb[16].mxu0  ;;  %v1460_v3 = vmul.f32 %v1451_v63, %v1263_v60  ;;  %v1975_v4 = vpop.f32.mrb[17].mxu1 }
 0x48d   : > { %v1459_v7 = vmul.f32 %v1405_v2, %v1262_v62  ;;  %v1969_v8 = vpop.f32.mrb[17].mxu0  ;;  %v1454_v9 = vpop.f32.mrb[18].mxu1 }
 0x48e   : > { %v1477_v10 = vcombine.low %v1458_v1, %v1460_v3  ;;  %v1478_v13 = vcombine.high %v1458_v1, %v1460_v3  ;;  %v1408_v14 = vpop.f32.mrb[18].mxu0  ;;  %v1976_v15 = vpop.f32.mrb[19].mxu1 }
 0x48f   : > { %v1461_v16 = vcombine.low %v1457_v5, %v1459_v7  ;;  %v1462_v17 = vcombine.high %v1457_v5, %v1459_v7  ;;  %v1970_v18 = vpop.f32.mrb[19].mxu0  ;;  %v1883_v15 = vld [vmem:[%s2829_s9] ss:$0 sm:$0xff] }
 0x490   : > { %v1485_v19 = vrot.slane %v1477_v10, %v2618_v31  ;;  %v1492_v20 = vrot.slane %v1478_v13, %v2618_v31 }
 0x491   : > { %v1469_v21 = vrot.slane %v1461_v16, %v2618_v31  ;;  %v1476_v22 = vrot.slane %v1462_v17, %v2618_v31 }
 0x493   : > { %v1493_v23 = vcombine.low %v1469_v21, %v1485_v19  ;;  %v1494_v24 = vcombine.high %v1469_v21, %v1485_v19  ;;  %v1509_v25 = vcombine.low %v1476_v22, %v1492_v20  ;;  %v1510_v26 = vcombine.high %v1476_v22, %v1492_v20 }
 0x495   : > { %v1501_v29 = vrot.slane %v1493_v23, %v2626_v38  ;;  %v1508_v28 = vrot.slane %v1494_v24, %v2626_v38  ;;  %v1517_v30 = vrot.slane %v1509_v25, %v2626_v38  ;;  %v1524_v32 = vrot.slane %v1510_v26, %v2626_v38 }
 0x497   : > { %v1529_v34 = vcombine.low %v1501_v29, %v1508_v28  ;;  %v1876_v33 = vcombine.high %v1501_v29, %v1508_v28  ;;  %v1545_v35 = vcombine.low %v1517_v30, %v1524_v32  ;;  %v1877_v11 = vcombine.high %v1517_v30, %v1524_v32 }
 0x499   : > { %v1536_v36 = vrot.slane %v1529_v34, %v2618_v31  ;;  %v1544_v37 = vrot.slane %v1876_v33, %v2618_v31  ;;  %v1552_v39 = vrot.slane %v1545_v35, %v2618_v31  ;;  %v1560_v40 = vrot.slane %v1877_v11, %v2618_v31 }
 0x49b   : > { %v1562_v41 = vcombine.high %v1536_v36, %v1544_v37  ;;  %v1578_v42 = vcombine.high %v1552_v39, %v1560_v40  ;;  %v1561_v0 = vcombine.low %v1536_v36, %v1544_v37  ;;  %v1577_v43 = vcombine.low %v1552_v39, %v1560_v40 }
 0x49d   : > { %v1576_v44 = vrot.slane %v1562_v41, %v2626_v38  ;;  %v1592_v45 = vrot.slane %v1578_v42, %v2626_v38  ;;  %v1569_v46 = vrot.slane %v1561_v0, %v2626_v38  ;;  %v1585_v47 = vrot.slane %v1577_v43, %v2626_v38 }
 0x49f   : > { %v1595_v48 = vcombine.low %v1576_v44, %v1592_v45  ;;  %v1594_v49 = vcombine.high %v1569_v46, %v1585_v47  ;;  %v1596_v50 = vcombine.high %v1576_v44, %v1592_v45  ;;  %v1593_v51 = vcombine.low %v1569_v46, %v1585_v47 }
 0x4a1   : > { %1602 = vrot.lane.b32.xlu0 %v1595_v48, %s2304_s24  ;;  %1598 = vrot.lane.b32.xlu1 %v1594_v49, %s2305_s21  ;;  %s2210_s24 = scalar_lea.vmem %s2777_s2, 128  ;;  %s2216_s21 = scalar_lea.vmem %s2215_s3, 256 }
 0x4a2   : > { %p2211_p2 = scmp.ne.s32.totalorder %s2777_s2, %s2210_s24  ;;  %p2218_p5 = scmp.lt.s32.totalorder %s2216_s21, %s2210_s24 }
 0x4a4   : > { %p2212_p6 = pnand %p2211_p2, %p2862_p13  ;;  %p2219_p3 = por %p2218_p5, %p2217_p4 }
 0x4a5   : > { %1606 = vrot.lane.b32.xlu1 %v1596_v50, %s2306_s20 }
 0x4a6   : > { %p2213_p10 = pneg %p2212_p6 }
 0x4a8   : > { %p2220_p7 = pnand %p2219_p3, %p2213_p10 }
 0x513   : > { %v1599_v31 = vpop.permute.xlu1 %1598  ;;  %v1603_v52 = vpop.permute.xlu0 %1602 }
 0x514   : > { %v1609_v53 = vsel %vm1027_vm2, %v1593_v51, %v1599_v31 }
 0x515   : > { %v1611_v55 = vsel %vm1610_vm4, %v1609_v53, %v1603_v52 }
 0x517   : > { %v1607_v54 = vpop.permute.xlu1 %1606 }
 0x518   : > { %v1613_v56 = vsel %vm1612_vm5, %v1611_v55, %v1607_v54 }
 0x519   : > { %v1614_v38 = vpack.c.bf16 %v1613_v56, %v1613_v56 }
 0x51b   : > { %1982 = vmatmul.mubr.msk.bf16.vlgmr.msra.gmra.mrb[20].mxu0 %vm468_vm1, %v1614_v38 }
 0x5ee   : > { %v1675_v58 = vpop.f32.mrb[20].mxu0 }
 0x5ef   : > { %v1676_v59 = vadd.f32 %v1878_v57, %v1675_v58  ;;  %v1983_v60 = vpop.f32.mrb[21].mxu0 }
 0x5f0   : > { %v1678_v61 = vpop.f32.mrb[22].mxu0 }
 0x5f1   : > { %v1984_v62 = vpop.f32.mrb[23].mxu0  ;;  %v1681_v63 = vadd.f32 %v1676_v59, %v2596_v6  ;;  %v1882_v6 = vld [vmem:[%s2828_s8] ss:$0 sm:$0xff] }
 0x5f3   : > { %v1682_v1 = vsel %vm468_vm1, %v1681_v63, 0.0 }
 0x5f4   : > { %1683 = vadd.xlane.f32.xlu1 %v1682_v1 }
 0x681   : > { %v1684_v2 = vpop.xlane.xlu1 %1683 }
 0x682   : > { %v1686_v3 = vmul.f32 0.03125, %v1684_v2 }
 0x684   : > { %v1687_v4 = vsub.f32 %v1681_v63, %v1686_v3 }
 0x686   : > { %v1688_v5 = vmul.f32 %v1687_v4, %v1687_v4 }
 0x688   : > { %v1689_v7 = vsel %vm468_vm1, %v1688_v5, 0.0 }
 0x689   : > { %1690 = vadd.xlane.f32.xlu0 %v1689_v7 }
 0x716   : > { %v1691_v8 = vpop.xlane.xlu0 %1690 }
 0x717   : > { %v1692_v9 = vmul.f32 0.03125, %v1691_v8 }
 0x719   : > { %v1693_v10 = vadd.f32 1e-05, %v1692_v9 }
 0x71b   : > { %2092 = vrsqrt.f32 %v1693_v10 }
 0x725   : > { %v2093_v13 = vpop.eup %2092 }
 0x726   : > { %v1695_v14 = vmul.f32 %v2093_v13, %v1687_v4 }
 0x728   : > { %v1703_v16 = vmul.f32 %v1882_v6, %v1695_v14 }
 0x72a   : > { %v1711_v17 = vadd.f32 %v1883_v15, %v1703_v16 }
 0x72c   : > { %1712 = vst.msk [vmem:[%s440_s28] sm:$0xff] %vm468_vm1, %v1711_v17 }
 0x72d   : > { %2223 = shalt.err (!%p2220_p7)
}
 0x72e   : > { %s2224_s18 = scalar_lea.hbm %s2775_s13, 128  ;;  %s2228_s19 = scalar_lea.hbm %s2830_s10, 256 }
 0x72f   : > { %p2225_p1 = scmp.ne.s32.totalorder %s2775_s13, %s2224_s18  ;;  %p2229_p0 = scmp.lt.u32.totalorder %s2775_s13, %s2830_s10 }
 0x730   : > { %p2230_p9 = scmp.lt.u32.totalorder %s2228_s19, %s2224_s18  ;;  %p2232_p2 = scmp.lt.u32.totalorder %s2224_s18, %s2775_s13 }
 0x731   : > { %p2226_p8 = pnand %p2225_p1, %p2862_p13 }
 0x732   : > { %p2231_p12 = por %p2230_p9, %p2229_p0 }
 0x733   : > { %p2227_p11 = pneg %p2226_p8 }
 0x734   : > { %p2233_p6 = por %p2232_p2, %p2231_p12 }
 0x736   : > { %p2234_p10 = pnand %p2233_p6, %p2227_p11 }
 0x738   : > { %2237 = shalt.err (!%p2234_p10)
}
 0x739   : > { %1997 = dma.vmem_to_hbm [thread:$0]  (%p2862_p13), %s2777_s2, 128, %s2775_s13, %s1714_s23  }
 0x73a PF: > { %s2863_s12 = sld [smem:[#allocation16_spill]]  ;;  %s2864_s11 = sld [smem:[#allocation18_spill]] }
 0x73b   : > { %p2866_p5 = scmp.ge.s32.totalorder %s2288_s16, 2 }
 0x740   : > { %s1739_s25 = sand.u32 1, %s2863_s12   ;;  %p2865_p4 = scmp.ne.s32.totalorder %s2864_s11, 0 }
 0x741   : > { %s1740_s28 = scalar_lea.sflag [#allocation4], %s1739_s25 }
 0x742   : > { %p2014_p3 = pnand %p2866_p5, %p2865_p4 }
 0x744   : > { %2271 = dma.done.wait (!%p2014_p3), %s1740_s28, 128  }
 0x745   : > { %2273 = vsyncadd (!%p2014_p3), %s1740_s28, 4294967168  ;;  %s2867_s16 = sld [smem:[#allocation19_spill]]  ;;  %s2868_s26 = sld [smem:[#allocation17_spill]] }
 0x746   : > { %s2869_s15 = sld [smem:[#allocation20_spill]]  ;;  %s2870_s13 = smov %s2280_s14 }
 0x74b   : > { %p27_p7 = scmp.ge.s32.totalorder %s2867_s16, 4   ;;  %s2871_s14 = smov %s2868_s26 }
 0x74d   :  { %29 = sbr.rel (!%p27_p7) target bundleno = 11 (0xb), region = 126 }
 0x754   :  { %1745 = vsyncpa [#allocation3], 1 }
 0x755   :  { %1747 = vsyncpa [#allocation3 + $0x1], 1 }
 0x756   :  { %1748 = vsyncpa [#allocation6], 1 }
 0x757   :  { %1750 = vsyncpa [#allocation6 + $0x1], 1 }
 0x758   :  { %1751 = vsyncpa [#allocation9], 1 }
 0x759   :  { %1752 = vsyncpa [#allocation4], 1 }
 0x75a   :  { %1754 = vsyncpa [#allocation4 + $0x1], 1 }

</bundles_post_ra>
